<compile_context>
chip_gen: v5e
topology: v5e:2x2
jax: 0.10.0
libtpu: 0.0.40
codegen_flags: <defaults>
</compile_context>

<pallas_src>
import jax
import jax.numpy as jnp
from jax import lax
from jax.experimental import pallas as pl
from jax.experimental.pallas import tpu as pltpu


def embed_kernel(tok_ref, w_ref, out_ref):
    """One (tm, tn) output tile: gather rows of W_E via a one-hot MXU matmul."""
    tok = tok_ref[...]                               # (tm, 1) int32
    tm = tok.shape[0]
    d_vocab = w_ref.shape[0]
    w = w_ref[...]                                   # (d_vocab, tn)
    ids = lax.broadcasted_iota(jnp.int32, (tm, d_vocab), 1)
    if w.dtype == jnp.float32:
        # f32 weights: request HIGHEST precision so the MXU does not silently
        # truncate to a single bf16 pass -> the 0/1 selection stays exact.
        onehot = (ids == tok).astype(jnp.float32)    # (tm, d_vocab)
        out = jnp.dot(onehot, w, preferred_element_type=jnp.float32,
                      precision=lax.Precision.HIGHEST)
    else:
        # bf16 / f16 weights: 0/1 is exact in the weight dtype; accumulate in
        # f32 on the native low-precision MXU path.
        onehot = (ids == tok).astype(w.dtype)
        out = jnp.dot(onehot, w, preferred_element_type=jnp.float32)
    out_ref[...] = out.astype(out_ref.dtype)


def _round_up(x, m):
    return pl.cdiv(x, m) * m


def embed_forward(tokens, w_e, *, tm=1024):
    """tokens: integer array of any shape; w_e: (d_vocab, d_model).

    Returns embeddings of shape tokens.shape + (d_model,), dtype = w_e.dtype.
    Note: out-of-range ids (<0 or >= d_vocab) give all-zero rows instead of
    raising like torch.nn.Embedding.
    """
    orig_shape = tokens.shape
    d_vocab, d_model = w_e.shape
    itemsize = jnp.dtype(w_e.dtype).itemsize

    # ---- d_model tile (tn): full d_model if the W block is small, otherwise
    # a multiple of 128 sized so one W buffer stays within ~8 MiB (keeps the
    # plan inside v7x's 64 MiB / 32 MiB-scoped VMEM).
    w_budget = 8 << 20
    if d_vocab * max(d_model, 128) * itemsize <= w_budget:
        tn = d_model
    else:
        tn = max(128, (w_budget // (d_vocab * itemsize)) // 128 * 128)
        tn = min(tn, d_model)
    n_pad = _round_up(d_model, tn)
    if n_pad != d_model:
        w_e = jnp.pad(w_e, ((0, 0), (0, n_pad - d_model)))
    n_tiles_n = n_pad // tn

    # ---- row tile (tm): large to amortize per-step overhead, bounded by the
    # VMEM footprint of the one-hot intermediate, out/acc tiles and the
    # lane-padded token tile.
    tok_flat = tokens.reshape(-1).astype(jnp.int32)
    M = tok_flat.shape[0]
    per_row_bytes = (max(d_vocab, 128) * 4          # one-hot intermediate (f32)
                     + 3 * max(tn, 128) * 4         # out (x2 buffers) + f32 acc
                     + 2 * 128 * 4)                 # lane-padded int32 token tile
    tm_cap = max(8, ((16 << 20) // per_row_bytes) // 8 * 8)
    tm = max(8, (int(tm) // 8) * 8)
    tm = min(tm, tm_cap, _round_up(M, 8))
    m_pad = _round_up(M, tm)
    if m_pad != M:
        tok_flat = jnp.pad(tok_flat, (0, m_pad - M))     # pad with token 0
    tok2d = tok_flat.reshape(m_pad, 1)
    n_tiles_m = m_pad // tm

    # ---- W_E BlockSpec: when d_model is untiled the index_map is constant,
    # so a single VMEM buffer suffices (default double-buffering would just
    # duplicate the resident weight).
    if n_tiles_n == 1:
        w_spec = pl.BlockSpec((d_vocab, tn), lambda i, j: (0, j),
                              pipeline_mode=pl.Buffered(1))
        n_w_bufs = 1
    else:
        w_spec = pl.BlockSpec((d_vocab, tn), lambda i, j: (0, j))
        n_w_bufs = 2

    # ---- explicit scoped-VMEM budget (defaults are only 16/32 MiB).
    est = (n_w_bufs * d_vocab * max(tn, 128) * itemsize   # W buffer(s), lane pad
           + 2 * tm * 128 * 4                             # token tile x2 bufs
           + 2 * tm * max(tn, 128) * itemsize             # out tile x2 bufs
           + tm * max(d_vocab, 128) * 4                   # one-hot intermediate
           + tm * max(tn, 128) * 4)                       # f32 accumulator
    vmem_limit = int(max(32 << 20, min(2 * est + (4 << 20), 64 << 20)))

    out = pl.pallas_call(
        embed_kernel,
        out_shape=jax.ShapeDtypeStruct((m_pad, n_pad), w_e.dtype),
        grid_spec=pl.GridSpec(
            grid=(n_tiles_m, n_tiles_n),
            in_specs=[
                # TODO(synk): for LLM-scale d_vocab, replace the one-hot matmul
                # with a scalar-prefetch + manual-DMA row gather (tokens in
                # SMEM, W_E left in HBM via pl.ANY) -- purely HBM-bound.
                pl.BlockSpec((tm, 1), lambda i, j: (i, 0)),   # token tile
                w_spec,                                       # W_E (d_vocab, tn)
            ],
            out_specs=pl.BlockSpec((tm, tn), lambda i, j: (i, j)),
        ),
        compiler_params=pltpu.CompilerParams(
            dimension_semantics=("parallel", "parallel"),
            vmem_limit_bytes=vmem_limit,
        ),
    )(tok2d, w_e)

    if m_pad != M:
        out = out[:M]
    if n_pad != d_model:
        out = out[:, :d_model]
    return out.reshape(orig_shape + (d_model,))


if __name__ == "__main__":
    # Config analog: d_model=32, d_vocab=64, init_range=0.02, d_type='float32'
    batch, seq = 2, 8
    d_vocab, d_model = 64, 32
    init_range = 0.02
    dtype = jnp.float32

    key = jax.random.PRNGKey(0)
    ktok, kw, kw2, ktok2 = jax.random.split(key, 4)

    tokens = jax.random.randint(ktok, (batch, seq), 0, d_vocab, dtype=jnp.int32)
    # nn.init.normal_(W_E.weight, std=init_range)
    w_e = (init_range * jax.random.normal(kw, (d_vocab, d_model))).astype(dtype)

    embed = embed_forward(tokens, w_e)
    jax.block_until_ready(embed)

    # Pure-JAX reference: plain embedding lookup.
    ref = w_e[tokens]
    assert embed.shape == (batch, seq, d_model)
    assert embed.dtype == w_e.dtype
    assert jnp.allclose(embed, ref, atol=1e-6, rtol=1e-6)

    # Larger-magnitude weights + non-multiple token count: exercises the exact
    # Precision.HIGHEST gather path and the row-padding logic.
    w_big = jax.random.normal(kw2, (d_vocab, d_model)).astype(dtype)
    toks2 = jax.random.randint(ktok2, (3, 7), 0, d_vocab, dtype=jnp.int32)
    out2 = embed_forward(toks2, w_big)
    jax.block_until_ready(out2)
    assert out2.shape == (3, 7, d_model)
    assert jnp.allclose(out2, w_big[toks2], atol=1e-6, rtol=1e-6)

    print("KERNEL_OK")
</pallas_src>

<mosaic_0001>
module attributes {stable_mosaic.version = 11 : i64} {
  func.func @embed_kernel(%arg0: i32, %arg1: i32, %arg2: memref<16x1xi32, #tpu.memory_space<vmem>>, %arg3: memref<64x32xf32, #tpu.memory_space<vmem>>, %arg4: memref<16x32xf32, #tpu.memory_space<vmem>>) attributes {dimension_semantics = [#tpu.dimension_semantics<parallel>, #tpu.dimension_semantics<parallel>], iteration_bounds = array<i64: 1, 1>, scalar_prefetch = 0 : i64, scratch_operands = 0 : i64, tpu.core_type = #tpu.core_type<tc>, window_params = [{transform_indices = @transform_0, window_bounds = array<i64: 16, 1>}, {pipeline_mode = #tpu.pipeline_mode<synchronous>, transform_indices = @transform_1, window_bounds = array<i64: 64, 32>}, {transform_indices = @transform_2, window_bounds = array<i64: 16, 32>}]} {
    %c0 = arith.constant 0 : index
    %c0_0 = arith.constant 0 : index
    %0 = vector.load %arg2[%c0, %c0_0] : memref<16x1xi32, #tpu.memory_space<vmem>>, vector<16x1xi32>
    %c0_1 = arith.constant 0 : index
    %c0_2 = arith.constant 0 : index
    %1 = vector.load %arg3[%c0_1, %c0_2] : memref<64x32xf32, #tpu.memory_space<vmem>>, vector<64x32xf32>
    %2 = tpu.iota {dimensions = array<i32: 1>} : vector<16x64xi32>
    %3 = vector.broadcast %0 : vector<16x1xi32> to vector<16x64xi32>
    %4 = arith.cmpi eq, %2, %3 : vector<16x64xi32>
    %5 = arith.extui %4 : vector<16x64xi1> to vector<16x64xi32>
    %6 = arith.sitofp %5 : vector<16x64xi32> to vector<16x64xf32>
    %cst = arith.constant dense<0.000000e+00> : vector<16x32xf32>
    %7 = tpu.matmul %6, %1, %cst {dimension_numbers = #tpu.dot_dimension_numbers<[1], [0], [0], [1], [0, 0, 1, 1], [], []>, precision = #tpu.contract_precision<fp32>} : vector<16x64xf32>, vector<64x32xf32>, vector<16x32xf32> -> vector<16x32xf32>
    %c0_3 = arith.constant 0 : index
    %c0_4 = arith.constant 0 : index
    %8 = vector.load %arg4[%c0_3, %c0_4] : memref<16x32xf32, #tpu.memory_space<vmem>>, vector<16x32xf32>
    tpu.vector_store %arg4[%c0_3, %c0_4], %7 {strides = array<i32>} : memref<16x32xf32, #tpu.memory_space<vmem>>, vector<16x32xf32>,
    return
  }
  func.func @transform_0(%arg0: i32, %arg1: i32) -> (i32, i32) {
    %c0_i32 = arith.constant 0 : i32
    %c0_i32_0 = arith.constant 0 : i32
    return %arg0, %c0_i32 : i32, i32
  }
  func.func @transform_1(%arg0: i32, %arg1: i32) -> (i32, i32) {
    %c0_i32 = arith.constant 0 : i32
    %c0_i32_0 = arith.constant 0 : i32
    return %c0_i32, %arg1 : i32, i32
  }
  func.func @transform_2(%arg0: i32, %arg1: i32) -> (i32, i32) {
    %c0_i32 = arith.constant 0 : i32
    return %arg0, %arg1 : i32, i32
  }
}

</mosaic_0001>

<bundles_post_ra>
// kernel: tpu_custom_call.1
= control target key start
LH: loop header
LB: loop body
LE: loop exit
PB: predicated region body
PF: predicated region fallthrough
CT: control target
= control target key end

     0   :  { %v388_v2 = vmov 0   ;;  %s508_s0 = inlined_call_operand.vmem [shape: s32[16,1], index: 0, kind: input, shape index: {}]   ;;  %s509_s1 = inlined_call_operand.vmem [shape: f32[64,32], index: 1, kind: input, shape index: {}]   ;;  %s510_s2 = inlined_call_operand.hbm [shape: f32[16,32], index: 2, kind: output, shape index: {}]  }
   0x1   :  { %v12_v0 = vld [vmem:[%s508_s0] sm:$0xff]  ;;  %v21_v1 = vld [vmem:[%s509_s1 + $0x38] sm:$0xff]  ;;  %361 = vset.pattern.permute.xlu0 %v388_v2  ;;  %v20_v4 = vld [vmem:[%s509_s1 + $0x30] sm:$0xff] }
   0x2   :  { %v414_v3 = vand.u32 4294901760, %v21_v1  ;;  %v19_v5 = vld [vmem:[%s509_s1 + $0x28] sm:$0xff]  ;;  %v18_v6 = vld [vmem:[%s509_s1 + $0x20] sm:$0xff]  ;;  %25 = vperm.xlu0 %361, %v12_v0   ;;  %v425_v7 = vand.u32 4294901760, %v20_v4  ;;  %v17_v10 = vld [vmem:[%s509_s1 + $0x18] sm:$0xff] }
   0x3   :  { %v427_v8 = vand.u32 4294901760, %v19_v5  ;;  %v429_v9 = vand.u32 4294901760, %v18_v6  ;;  %v16_v11 = vld [vmem:[%s509_s1 + $0x10] sm:$0xff]  ;;  %v15_v12 = vld [vmem:[%s509_s1 + $0x8] sm:$0xff]  ;;  %v442_v14 = vand.u32 4294901760, %v17_v10 }
   0x4   :  { %v93_v13 = vsub.f32 %v21_v1, %v414_v3  ;;  %201 = vmatpush.msra.mxu3 %v414_v3  ;;  %52 = vmatpush.msra.mxu0 %v414_v3  ;;  %v445_v15 = vand.u32 4294901760, %v16_v11  ;;  %v447_v16 = vand.u32 4294901760, %v15_v12 }
   0x5   :  { %7 = vsyncpa [#allocation3], 0  ;;  %v99_v17 = vsub.f32 %v20_v4, %v425_v7  ;;  %v105_v18 = vsub.f32 %v19_v5, %v427_v8  ;;  %v111_v19 = vsub.f32 %v18_v6, %v429_v9  ;;  %v117_v21 = vsub.f32 %v17_v10, %v442_v14  ;;  %v13_v26 = vld [vmem:[%s508_s0 + $0x8] sm:$0xff]  ;;  %v14_v45 = vld [vmem:[%s509_s1] sm:$0xff]  ;;  %s390_s1 = smov [#allocation2]   ;;  %s320_s3 = sshll.u32 %s510_s2, 4  ;;  %s321_s3 = int_to_ptr.hbm [resolvable:$true] %s320_s3 }
   0x6   :  { %v94_v20 = vand.u32 4294901760, %v93_v13  ;;  %159 = vmatpush.msra.mxu2 %v93_v13  ;;  %203 = vmatpush.msra.mxu3 %v425_v7  ;;  %v123_v22 = vsub.f32 %v16_v11, %v445_v15  ;;  %v129_v29 = vsub.f32 %v15_v12, %v447_v16  ;;  %v65_v46 = vand.u32 4294901760, %v14_v45  ;;  %s318_s28 = sshll.u32 %s390_s1, 4  ;;  %s391_s4 = smov 128   ;;  %s319_s28 = int_to_ptr.vmem [resolvable:$true] %s318_s28 }
   0x7   :  { %v100_v23 = vand.u32 4294901760, %v99_v17  ;;  %v106_v24 = vand.u32 4294901760, %v105_v18  ;;  %v455_v25 = vand.u32 4294901760, %v111_v19  ;;  %54 = vmatpush.msra.mxu0 %v425_v7  ;;  %v461_v28 = vand.u32 4294901760, %v117_v21  ;;  %s392_s5 = smov 8  }
   0x8   :  { %v95_v27 = vsub.f32 %v93_v13, %v94_v20  ;;  %162 = vmatpush.msra.mxu2 %v99_v17  ;;  %205 = vmatpush.msra.mxu3 %v427_v8  ;;  %v124_v34 = vand.u32 4294901760, %v123_v22  ;;  %v130_v38 = vand.u32 4294901760, %v129_v29  ;;  %v135_v47 = vsub.f32 %v14_v45, %v65_v46 }
   0x9   :  { %v101_v30 = vsub.f32 %v99_v17, %v100_v23  ;;  %v107_v31 = vsub.f32 %v105_v18, %v106_v24  ;;  %56 = vmatpush.msra.mxu0 %v427_v8  ;;  %v113_v33 = vsub.f32 %v111_v19, %v455_v25  ;;  %v119_v37 = vsub.f32 %v117_v21, %v461_v28 }
   0xa   :  { %v96_v32 = vand.u32 4294901760, %v95_v27  ;;  %165 = vmatpush.msra.mxu2 %v105_v18  ;;  %207 = vmatpush.msra.mxu3 %v429_v9  ;;  %v125_v40 = vsub.f32 %v123_v22, %v124_v34  ;;  %v131_v42 = vsub.f32 %v129_v29, %v130_v38  ;;  %v136_v48 = vand.u32 4294901760, %v135_v47 }
   0xb   :  { %28 = vperm.xlu0 %361, %v13_v26   ;;  %v102_v35 = vand.u32 4294901760, %v101_v30  ;;  %58 = vmatpush.msra.mxu0 %v429_v9  ;;  %v108_v36 = vand.u32 4294901760, %v107_v31  ;;  %v114_v39 = vand.u32 4294901760, %v113_v33  ;;  %v120_v41 = vand.u32 4294901760, %v119_v37 }
   0xc   :  { %97 = vmatpush.msra.mxu1 %v96_v32  ;;  %168 = vmatpush.msra.mxu2 %v111_v19  ;;  %v126_v43 = vand.u32 4294901760, %v125_v40  ;;  %v132_v44 = vand.u32 4294901760, %v131_v42  ;;  %v137_v49 = vsub.f32 %v135_v47, %v136_v48  ;;  %v22_v51 = vlaneseq }
   0xd   :  { %209 = vmatpush.msra.mxu3 %v442_v14  ;;  %60 = vmatpush.msra.mxu0 %v442_v14  ;;  %vm36_vm0 = vcmask 523264   ;;  %v389_v54 = vmov 0.0   ;;  %vm311_vm3 = vcmask 261120  }
   0xe   :  { %103 = vmatpush.msra.mxu1 %v102_v35  ;;  %171 = vmatpush.msra.mxu2 %v117_v21  ;;  %v138_v50 = vand.u32 4294901760, %v137_v49  ;;  %v23_v52 = vand.u32 127, %v22_v51 }
   0xf   :  { %211 = vmatpush.msra.mxu3 %v445_v15  ;;  %62 = vmatpush.msra.mxu0 %v445_v15 }
  0x10   :  { %109 = vmatpush.msra.mxu1 %v108_v36  ;;  %174 = vmatpush.msra.mxu2 %v123_v22 }
  0x11   :  { %213 = vmatpush.msra.mxu3 %v447_v16  ;;  %64 = vmatpush.msra.mxu0 %v447_v16 }
  0x12   :  { %115 = vmatpush.msra.mxu1 %v114_v39  ;;  %177 = vmatpush.msra.mxu2 %v129_v29 }
  0x13   :  { %215 = vmatpush.msra.mxu3 %v65_v46  ;;  %66 = vmatpush.msra.mxu0 %v65_v46 }
  0x14   :  { %121 = vmatpush.msra.mxu1 %v120_v41  ;;  %180 = vmatpush.msra.mxu2 %v135_v47 }
  0x15   :  { %348 = vmatpush.msrb.mxu3 %v414_v3  ;;  %240 = vmatpush.msrb.mxu0 %v94_v20 }
  0x16   :  { %127 = vmatpush.msra.mxu1 %v126_v43  ;;  %340 = vmatpush.msrb.mxu2 %v94_v20 }
  0x17   :  { %349 = vmatpush.msrb.mxu3 %v425_v7  ;;  %244 = vmatpush.msrb.mxu0 %v100_v23 }
  0x18   :  { %133 = vmatpush.msra.mxu1 %v132_v44  ;;  %341 = vmatpush.msrb.mxu2 %v100_v23 }
  0x19   :  { %350 = vmatpush.msrb.mxu3 %v427_v8  ;;  %248 = vmatpush.msrb.mxu0 %v106_v24 }
  0x1a   :  { %342 = vmatpush.msrb.mxu2 %v106_v24  ;;  %139 = vmatpush.msra.mxu1 %v138_v50 }
  0x1b   :  { %351 = vmatpush.msrb.mxu3 %v429_v9  ;;  %252 = vmatpush.msrb.mxu0 %v455_v25 }
  0x1c   :  { %287 = vmatpush.msrb.mxu1 %v414_v3  ;;  %343 = vmatpush.msrb.mxu2 %v455_v25 }
  0x1d   :  { %352 = vmatpush.msrb.mxu3 %v442_v14  ;;  %256 = vmatpush.msrb.mxu0 %v461_v28 }
  0x1e   :  { %289 = vmatpush.msrb.mxu1 %v425_v7  ;;  %344 = vmatpush.msrb.mxu2 %v461_v28 }
  0x1f   :  { %353 = vmatpush.msrb.mxu3 %v445_v15  ;;  %260 = vmatpush.msrb.mxu0 %v124_v34 }
  0x20   :  { %291 = vmatpush.msrb.mxu1 %v427_v8  ;;  %345 = vmatpush.msrb.mxu2 %v124_v34 }
  0x21   :  { %354 = vmatpush.msrb.mxu3 %v447_v16  ;;  %264 = vmatpush.msrb.mxu0 %v130_v38 }
  0x22   :  { %293 = vmatpush.msrb.mxu1 %v429_v9  ;;  %346 = vmatpush.msrb.mxu2 %v130_v38 }
  0x23   :  { %355 = vmatpush.msrb.mxu3 %v65_v46  ;;  %268 = vmatpush.msrb.mxu0 %v136_v48 }
  0x24   :  { %295 = vmatpush.msrb.mxu1 %v442_v14  ;;  %347 = vmatpush.msrb.mxu2 %v136_v48 }
  0x26   :  { %297 = vmatpush.msrb.mxu1 %v445_v15 }
  0x28   :  { %299 = vmatpush.msrb.mxu1 %v447_v16 }
  0x2a   :  { %301 = vmatpush.msrb.mxu1 %v65_v46 }
  0x74   :  { %v26_v53 = vpop.permute.xlu0 %25 }
  0x75   :  { %vm30_vm1 = vcmp.eq.s32.totalorder %v23_v52, %v26_v53 }
  0x76   :  { %v332_v55 = vsel %vm30_vm1, 1.0, %v389_v54 }
  0x77   :  { %334 = vmatmul.msk.f32.vlgmr.msra.gmra.mxu1 %vm36_vm0, %v332_v55  ;;  %v38_v56 = vsel %vm36_vm0, %v332_v55, 0 }
  0x78   :  { %v68_v57 = vsub.f32 %v38_v56, %v38_v56 }
  0x7a   :  { %183 = vmatmul.f32.vlgmr.msra.gmra.mxu2 %v68_v57  ;;  %v69_v58 = vand.u32 4294901760, %v68_v57 }
  0x7c   :  { %219 = vmatmul.f32.vlgmr.msra.gmra.mxu3 %v69_v58  ;;  %v70_v60 = vsub.f32 %v68_v57, %v69_v58 }
  0x7d   :  { %v29_v59 = vpop.permute.xlu0 %28 }
  0x7e   :  { %vm31_vm2 = vcmp.eq.s32.totalorder %v23_v52, %v29_v59  ;;  %v71_v62 = vand.u32 4294901760, %v70_v60 }
  0x7f   :  { %v333_v61 = vsel %vm31_vm2, 1.0, %v389_v54 }
  0x80   :  { %335 = vmatmul.msk.f32.gmra.mxu1 %vm36_vm0, %v333_v61  ;;  %v41_v63 = vsel %vm36_vm0, %v333_v61, 0  ;;  %72 = vmatmul.f32.vlgmr.msra.gmra.mxu0 %v71_v62 }
  0x81   :  { %v76_v0 = vsub.f32 %v41_v63, %v41_v63 }
  0x83   :  { %188 = vmatmul.f32.gmra.mxu2 %v76_v0  ;;  %v77_v1 = vand.u32 4294901760, %v76_v0 }
  0x85   :  { %225 = vmatmul.f32.gmra.mxu3 %v77_v1  ;;  %v78_v2 = vsub.f32 %v76_v0, %v77_v1 }
  0x87   :  { %v79_v3 = vand.u32 4294901760, %v78_v2 }
  0x88   :  { %338 = vmatmul.msk.f32.vlgmr.msrb.gmra.mxu1 %vm36_vm0, %v332_v55 }
  0x89   :  { %80 = vmatmul.f32.gmra.mxu0 %v79_v3 }
  0x8b   :  { %337 = vmatmul.msk.f32.vlgmr.msrb.gmra.mxu2 %vm36_vm0, %v333_v61 }
  0x8d   :  { %339 = vmatmul.msk.f32.vlgmr.msrb.gmra.mxu3 %vm36_vm0, %v333_v61 }
  0x91   :  { %336 = vmatmul.msk.f32.vlgmr.msrb.gmra.mxu0 %vm36_vm0, %v332_v55 }
  0xf4   :  { %v142_v4 = vpop.f32.mrf.mxu1 }
  0xfd   :  { %v73_v5 = vpop.f32.mrf.mxu0  ;;  %v184_v6 = vpop.f32.mrf.mxu2 }
  0xfe   :  { %v146_v8 = vpop.f32.mrf.mxu1  ;;  %v143_v9 = vadd.f32 %v142_v4, %v73_v5 }
  0xff   :  { %v220_v7 = vpop.f32.mrf.mxu3 }
 0x100   :  { %v185_v14 = vadd.f32 %v184_v6, %v143_v9 }
 0x102   :  { %v221_v16 = vadd.f32 %v220_v7, %v185_v14 }
 0x106   :  { %v81_v10 = vpop.f32.mrf.mxu0  ;;  %v189_v11 = vpop.f32.mrf.mxu2 }
 0x107   :  { %v147_v12 = vadd.f32 %v146_v8, %v81_v10  ;;  %v304_v22 = vpop.f32.mrf.mxu1 }
 0x108   :  { %v226_v13 = vpop.f32.mrf.mxu3 }
 0x109   :  { %v190_v15 = vadd.f32 %v189_v11, %v147_v12 }
 0x10b   :  { %v227_v17 = vadd.f32 %v226_v13, %v190_v15 }
 0x10e   :  { %v271_v18 = vpop.f32.mrf.mxu0  ;;  %v275_v19 = vpop.f32.mrf.mxu2 }
 0x10f   :  { %v272_v20 = vadd.f32 %v271_v18, %v221_v16  ;;  %v276_v21 = vadd.f32 %v275_v19, %v227_v17 }
 0x110   :  { %v308_v23 = vpop.f32.mrf.mxu3 }
 0x111   :  { %v305_v24 = vadd.f32 %v304_v22, %v272_v20  ;;  %v309_v25 = vadd.f32 %v308_v23, %v276_v21 }
 0x113   :  { %312 = vst.msk [vmem:[#allocation2] sm:$0xff] %vm311_vm3, %v305_v24 }
 0x114   :  { %313 = vst.msk [vmem:[#allocation2 + $0x8] sm:$0xff] %vm311_vm3, %v309_v25 }
 0x115   :  { %326 = dma.vmem_to_hbm [thread:$0]  %s319_s28, 256, %s321_s3, [#allocation3], %s391_s4, %s391_s4, %s392_s5  }
 0x116   :  { %386 = dma.done.wait [#allocation3], 256  }
 0x117   :  { %387 = vsyncadd [#allocation3], 4294967040 }
 0x118   :  { %331 = vsyncpa [#allocation3], 1 }

</bundles_post_ra>
